<compile_context>
chip_gen: v6e
topology: v6e:2x2x1
jax: 0.10.0
libtpu: 0.0.40
codegen_flags: <defaults>
</compile_context>

<pallas_src>
import math

import jax
import jax.numpy as jnp
from jax.experimental import pallas as pl
from jax.experimental.pallas import tpu as pltpu


def _param_prep_kernel(pre_ref, params_ref):
    """pre_ref: (3, N) = [bias; pre_precision; pre_weights] -> params_ref (3, N)."""
    p = pre_ref[...]                                    # (3, N) f32
    bias = p[0:1, :]                                    # (1, N)
    precision = jnp.maximum(p[1:2, :], 0.0)             # relu(pre_precision)
    pw = p[2:3, :]
    # Numerically stable softmax over the N (lane) axis.  Exact division:
    # this runs once per call, so there is no reason to trade accuracy here.
    pw_max = jnp.max(pw, axis=-1, keepdims=True)
    e = jnp.exp(pw - pw_max)
    weights = e / jnp.sum(e, axis=-1, keepdims=True)
    params_ref[...] = jnp.concatenate([bias, precision, weights], axis=0)


def _utility_decreasing_kernel(x_ref, params_ref, o_ref):
    """x_ref: (TB, 1); params_ref: (3, N) resident; o_ref: (TB, 1)."""
    x = x_ref[...]                                      # (TB, 1) f32
    p = params_ref[...]                                 # (3, N) f32
    bias = p[0:1, :]
    precision = p[1:2, :]
    weights = p[2:3, :]

    # z = (x - bias) * precision  -> (TB, N)
    z = (x - bias) * precision

    # sigmoid via tanh: single EUP transcendental + one VPU FMA per element.
    s = 0.5 * (jnp.tanh(0.5 * z) + 1.0)

    # Weighted sum over the N (lane) axis -> (TB, 1).  Kept on VPU/XLU on
    # purpose: the MXU would run at <1% utilization for a 1-column result.
    y = jnp.sum(s * weights, axis=-1, keepdims=True)

    # Decreasing utility.
    o_ref[...] = 1.0 - y


def utility_decreasing_attention(x, bias, pre_precision, pre_weights, *, tile_b=512):
    """x: (B,) or (B, 1) f32; bias/pre_precision/pre_weights: (N,) or (1, N) f32.

    Returns (B, 1) f32 with out[b] = 1 - sum_n softmax(pre_w)[n] *
                                        sigmoid((x[b]-bias[n])*relu(pre_prec)[n]).
    """
    x = jnp.asarray(x, jnp.float32).reshape(-1, 1)
    b_total = x.shape[0]
    n = jnp.asarray(bias).shape[-1]
    pre_params = jnp.concatenate(
        [
            jnp.asarray(bias, jnp.float32).reshape(1, n),
            jnp.asarray(pre_precision, jnp.float32).reshape(1, n),
            jnp.asarray(pre_weights, jnp.float32).reshape(1, n),
        ],
        axis=0,
    )  # (3, N)

    # --- Stage 1: relu + softmax, computed once (hoisted out of per-tile body).
    params = pl.pallas_call(
        _param_prep_kernel,
        out_shape=jax.ShapeDtypeStruct((3, n), jnp.float32),
        grid=(1,),
        in_specs=[pl.BlockSpec((3, n), lambda i: (0, 0))],
        out_specs=pl.BlockSpec((3, n), lambda i: (0, 0)),
    )(pre_params)

    # Lane-pad N to a multiple of 128 (pad rows contribute sigmoid(0)*0 = 0).
    n_pad = ((n + 127) // 128) * 128
    if n_pad != n:
        params = jnp.pad(params, ((0, 0), (0, n_pad - n)))

    # --- Stage 2: batch tiled over a parallel grid axis.
    # Cap TB so the (TB, N) z/s intermediate stays well under the scoped VMEM
    # budget on every generation (v7x has half the VMEM of v5e/v6e).
    tb = min(int(tile_b), max(8, (4 * 1024 * 1024) // (4 * n_pad)))
    tb = max(8, (tb // 8) * 8)                  # multiple of 8 (sublane)
    tb = min(tb, ((b_total + 7) // 8) * 8)      # don't over-pad tiny batches
    b_pad = ((b_total + tb - 1) // tb) * tb
    x_pad = jnp.pad(x, ((0, b_pad - b_total), (0, 0))) if b_pad != b_total else x

    out = pl.pallas_call(
        _utility_decreasing_kernel,
        out_shape=jax.ShapeDtypeStruct((b_pad, 1), jnp.float32),
        grid=(b_pad // tb,),
        in_specs=[
            pl.BlockSpec((tb, 1), lambda i: (i, 0)),      # batch tile
            pl.BlockSpec((3, n_pad), lambda i: (0, 0)),   # params stay resident
        ],
        out_specs=pl.BlockSpec((tb, 1), lambda i: (i, 0)),
        compiler_params=pltpu.CompilerParams(
            dimension_semantics=("parallel",)  # shard batch tiles across TCs (v7x)
        ),
    )(x_pad, params)
    return out[:b_total]


def _reference(x, bias, pre_precision, pre_weights):
    precision = jnp.maximum(pre_precision, 0.0)
    weights = jax.nn.softmax(pre_weights, axis=-1)
    z = (x - bias) * precision
    s = jax.nn.sigmoid(z)
    y = jnp.sum(s * weights, axis=-1, keepdims=True)
    return 1.0 - y


if __name__ == "__main__":
    nb_prim = 128   # number of sigmoid primitives (N), lane-aligned
    batch = 8       # number of scalar inputs evaluated at once

    key = jax.random.PRNGKey(0)
    k_prec, k_w, k_x = jax.random.split(key, 3)

    # Deterministic parameter init mirroring the module's __init__:
    #   pre_precision = rand(N) * N
    #   bias          = linspace(1/N, 1 - 1/N, N)
    #   pre_weights   = randn(N) * 0.1 + log(2)
    pre_precision = (jax.random.uniform(k_prec, (nb_prim,), jnp.float32)
                     * nb_prim).reshape(1, nb_prim)
    bias = jnp.linspace(1.0 / nb_prim, 1.0 - 1.0 / nb_prim, nb_prim,
                        dtype=jnp.float32).reshape(1, nb_prim)
    pre_weights = (jax.random.normal(k_w, (nb_prim,), jnp.float32) * 0.1
                   + math.log(2.0)).reshape(1, nb_prim)

    # Inputs in [0, 1], one scalar per batch row.
    x = jax.random.uniform(k_x, (batch, 1), jnp.float32)

    out = utility_decreasing_attention(x, bias, pre_precision, pre_weights)
    out = jax.block_until_ready(out)

    ref = _reference(x, bias, pre_precision, pre_weights)
    assert out.shape == (batch, 1)
    assert jnp.allclose(out, ref, atol=2e-5, rtol=2e-5), (out, ref)

    print("KERNEL_OK")
</pallas_src>

<mosaic_0001>
module attributes {stable_mosaic.version = 11 : i64} {
  func.func @_param_prep_kernel(%arg0: i32, %arg1: memref<3x128xf32, #tpu.memory_space<vmem>>, %arg2: memref<3x128xf32, #tpu.memory_space<vmem>>) attributes {dimension_semantics = [#tpu.dimension_semantics<arbitrary>], iteration_bounds = array<i64: 1>, scalar_prefetch = 0 : i64, scratch_operands = 0 : i64, tpu.core_type = #tpu.core_type<tc>, window_params = [{pipeline_mode = #tpu.pipeline_mode<synchronous>, transform_indices = @transform_0, window_bounds = array<i64: 3, 128>}, {pipeline_mode = #tpu.pipeline_mode<synchronous>, transform_indices = @transform_1, window_bounds = array<i64: 3, 128>}]} {
    %c0 = arith.constant 0 : index
    %c0_0 = arith.constant 0 : index
    %0 = vector.load %arg1[%c0, %c0_0] : memref<3x128xf32, #tpu.memory_space<vmem>>, vector<3x128xf32>
    %1 = vector.extract_strided_slice %0 {offsets = [0, 0], sizes = [1, 128], strides = [1, 1]} : vector<3x128xf32> to vector<1x128xf32>
    %2 = vector.extract_strided_slice %0 {offsets = [1, 0], sizes = [1, 128], strides = [1, 1]} : vector<3x128xf32> to vector<1x128xf32>
    %cst = arith.constant 0.000000e+00 : f32
    %3 = vector.broadcast %cst : f32 to vector<1x128xf32>
    %4 = arith.maximumf %2, %3 : vector<1x128xf32>
    %5 = vector.extract_strided_slice %0 {offsets = [2, 0], sizes = [1, 128], strides = [1, 1]} : vector<3x128xf32> to vector<1x128xf32>
    %cst_1 = arith.constant dense<0xFF800000> : vector<1xf32>
    %6 = vector.multi_reduction <maximumf>, %5, %cst_1 [1] : vector<1x128xf32> to vector<1xf32>
    %7 = vector.shape_cast %6 : vector<1xf32> to vector<1x1xf32>
    %8 = vector.broadcast %7 : vector<1x1xf32> to vector<1x128xf32>
    %9 = arith.subf %5, %8 : vector<1x128xf32>
    %10 = math.exp %9 : vector<1x128xf32>
    %cst_2 = arith.constant dense<0.000000e+00> : vector<1xf32>
    %11 = vector.multi_reduction <add>, %10, %cst_2 [1] : vector<1x128xf32> to vector<1xf32>
    %12 = vector.shape_cast %11 : vector<1xf32> to vector<1x1xf32>
    %13 = vector.broadcast %12 : vector<1x1xf32> to vector<1x128xf32>
    %14 = arith.divf %10, %13 : vector<1x128xf32>
    %15 = tpu.concatenate %1, %4, %14 in 0 : vector<1x128xf32>, vector<1x128xf32>, vector<1x128xf32> -> vector<3x128xf32>
    %c0_3 = arith.constant 0 : index
    %c0_4 = arith.constant 0 : index
    %16 = vector.load %arg2[%c0_3, %c0_4] : memref<3x128xf32, #tpu.memory_space<vmem>>, vector<3x128xf32>
    tpu.vector_store %arg2[%c0_3, %c0_4], %15 {strides = array<i32>} : memref<3x128xf32, #tpu.memory_space<vmem>>, vector<3x128xf32>,
    return
  }
  func.func @transform_0(%arg0: i32) -> (i32, i32) {
    %c0_i32 = arith.constant 0 : i32
    %c0_i32_0 = arith.constant 0 : i32
    %c0_i32_1 = arith.constant 0 : i32
    return %c0_i32, %c0_i32_0 : i32, i32
  }
  func.func @transform_1(%arg0: i32) -> (i32, i32) {
    %c0_i32 = arith.constant 0 : i32
    %c0_i32_0 = arith.constant 0 : i32
    %c0_i32_1 = arith.constant 0 : i32
    return %c0_i32, %c0_i32_0 : i32, i32
  }
}

</mosaic_0001>

<bundles_post_ra>
// kernel: tpu_custom_call.1
= control target key start
LH: loop header
LB: loop body
LE: loop exit
PB: predicated region body
PF: predicated region fallthrough
CT: control target
= control target key end

     0   :  { %6 = vsyncpa [#allocation3], 0  ;;  %s123_s0 = inlined_call_operand.hbm [shape: f32[3,128], index: 0, kind: input, shape index: {}]   ;;  %s124_s1 = inlined_call_operand.hbm [shape: f32[3,128], index: 1, kind: output, shape index: {}]  }
   0x1   :  { %7 = vsyncpa [#allocation4], 0  ;;  %s105_s6 = smov [#allocation2]  }
   0x2   :  { %s14_s7 = sshll.u32 %s105_s6, 4  ;;  %s15_s7 = int_to_ptr.vmem [resolvable:$true] %s14_s7 }
   0x3   :  { %s69_s8 = scalar_lea.vmem %s15_s7, 64  ;;  %p74_p1 = scmp.lt.s32.totalorder %s15_s7, %s15_s7 }
   0x4   :  { %p70_p0 = scmp.ne.s32.totalorder %s15_s7, %s69_s8  ;;  %p75_p2 = scmp.lt.s32.totalorder %s69_s8, %s69_s8 }
   0x6   :  { %p76_p3 = por %p75_p2, %p74_p1 }
   0x8   :  { %p77_p4 = pnand %p76_p3, %p70_p0 }
   0xa   :  { %80 = shalt.err (!%p77_p4)
}
   0xb   :  { %17 = dma.hbm_to_vmem [thread:$0]  %s123_s0, 64, %s15_s7, [#allocation3]  }
   0xc   :  { %101 = dma.done.wait [#allocation3], 64  }
   0xd   :  { %102 = vsyncadd [#allocation3], 4294967232  ;;  %vm23_vm0 = vcmask 1042434   ;;  %v21_v0 = vld [vmem:[#allocation2] sm:$0x7]  ;;  %vm35_vm1 = vcmask 1040384  }
   0xe   :  { %v24_v1 = vsel %vm23_vm0, %v21_v0, -inf  ;;  %v22_v8 = vmax.f32 %v21_v0, 0.0  ;;  %s106_s11 = smov [#allocation5]   ;;  %vm37_vm2 = vcmask 1041408  }
   0xf   :  { %25 = vmax.xlane.f32.xlu0 %v24_v1  ;;  %s46_s12 = sshll.u32 %s106_s11, 4  ;;  %s47_s12 = int_to_ptr.vmem [resolvable:$true] %s46_s12 }
  0x10   :  { %v36_v10 = vsel %vm35_vm1, %v21_v0, %v22_v8  ;;  %s81_s0 = scalar_lea.vmem %s47_s12, 64  ;;  %p86_p6 = scmp.lt.s32.totalorder %s47_s12, %s47_s12 }
  0x11   :  { %p82_p5 = scmp.ne.s32.totalorder %s47_s12, %s81_s0  ;;  %p87_p7 = scmp.lt.s32.totalorder %s81_s0, %s81_s0 }
  0x13   :  { %p88_p8 = por %p87_p7, %p86_p6 }
  0x15   :  { %p89_p9 = pnand %p88_p8, %p82_p5 }
  0x98   :  { %v26_v2 = vpop.xlane.xlu0 %25 }
  0x99   :  { %v27_v3 = vsub.f32 %v21_v0, %v26_v2 }
  0x9b   :  { %v28_v4 = vmul.f32 1.442695, %v27_v3 }
  0x9d   :  { %57 = vpow2.f32 %v28_v4 }
  0xaa   :  { %v58_v5 = vpop.eup %57 }
  0xab   :  { %v30_v6 = vsel %vm23_vm0, %v58_v5, 0.0 }
  0xac   :  { %31 = vadd.xlane.f32.xlu0 %v30_v6 }
 0x135   :  { %v32_v7 = vpop.xlane.xlu0 %31 }
 0x136   :  { %59 = vrcp.f32 %v32_v7 }
 0x143   :  { %v60_v9 = vpop.eup %59 }
 0x144   :  { %v34_v11 = vmul.f32 %v60_v9, %v58_v5 }
 0x146   :  { %v38_v12 = vsel %vm37_vm2, %v36_v10, %v34_v11 }
 0x147   :  { %39 = vst [vmem:[#allocation5] sm:$0x7] %v38_v12 }
 0x148   :  { %92 = shalt.err (!%p89_p9)
}
 0x149   :  { %49 = dma.vmem_to_hbm [thread:$0]  %s47_s12, 64, %s124_s1, [#allocation4]  }
 0x14a   :  { %103 = dma.done.wait [#allocation4], 64  }
 0x14b   :  { %104 = vsyncadd [#allocation4], 4294967232 }
 0x14c   :  { %53 = vsyncpa [#allocation3], 1 }
 0x14d   :  { %54 = vsyncpa [#allocation4], 1 }

</bundles_post_ra>
